<compile_context>
chip_gen: v7x
topology: tpu7x:2x2x1
jax: 0.10.0
libtpu: 0.0.40
codegen_flags: <defaults>
</compile_context>

<pallas_src>
import functools

import jax
import jax.numpy as jnp
from jax.experimental import pallas as pl
from jax.experimental.pallas import tpu as pltpu


def _focusing_term(one_minus_pt, gamma):
    """(1 - pt)**gamma, specialized for integer gamma (VPU multiplies only)."""
    g = float(gamma)
    if g == 0.0:
        return jnp.ones_like(one_minus_pt)
    if g.is_integer() and 0 < g <= 8:
        out = one_minus_pt
        for _ in range(int(g) - 1):
            out = out * one_minus_pt
        return out
    # Non-integer gamma: guarded exp(g*log(x)) path; 0**g must be 0, not nan.
    return jnp.where(one_minus_pt > 0.0,
                     jnp.power(jnp.maximum(one_minus_pt, 1e-30), g),
                     0.0)


def _per_row_focal(logits_ref, targets_ref, alphat_ref, *, gamma, n_total, tile_n):
    """Per-sample focal loss for the current (TILE_N, C) block; padded rows = 0."""
    logits = logits_ref[...].astype(jnp.float32)             # (tn, C)
    tgt = targets_ref[...]                                    # (tn, 1) int32
    alpha_t = alphat_ref[...]                                 # (tn, 1) f32, pre-gathered
    tn, c = logits.shape

    # Numerically-stable log-softmax pieces (only full-tile passes left:
    # max-reduce, subtract, exp, sum-reduce, masked select+reduce).
    row_max = jnp.max(logits, axis=-1, keepdims=True)         # (tn, 1)   XLU
    shifted = logits - row_max                                 # (tn, C)   VPU
    exp_shifted = jnp.exp(shifted)                             # (tn, C)   EUP
    denom = jnp.sum(exp_shifted, axis=-1, keepdims=True)       # (tn, 1)   XLU

    # Target logit via a masked select + reduce -- no f32 one-hot materialized.
    col = jax.lax.broadcasted_iota(jnp.int32, (tn, c), dimension=1)
    tgt_shifted = jnp.sum(jnp.where(col == tgt, shifted, 0.0),
                          axis=-1, keepdims=True)              # (tn, 1)   XLU

    log_denom = jnp.log(denom)                                 # (tn, 1)   EUP
    ce = log_denom - tgt_shifted                               # (tn, 1) per-sample CE
    pt = jnp.exp(tgt_shifted - log_denom)                      # = exp(-ce), (tn, 1) EUP

    one_minus_pt = jnp.maximum(1.0 - pt, 0.0)
    mod = _focusing_term(one_minus_pt, gamma)                  # (tn, 1)
    focal = alpha_t * mod * ce                                 # (tn, 1)

    # Mask padded rows of the ragged last tile against the *global* N
    # (jnp.where replaces -- garbage logits in padded rows can never leak).
    row = jax.lax.broadcasted_iota(jnp.int32, (tn, 1), dimension=0)
    valid = (pl.program_id(0) * tile_n + row) < n_total
    return jnp.where(valid, focal, 0.0)


def _focal_partial_sum_kernel(logits_ref, targets_ref, alphat_ref, out_ref, *,
                              gamma, n_total, tile_n):
    focal = _per_row_focal(logits_ref, targets_ref, alphat_ref,
                           gamma=gamma, n_total=n_total, tile_n=tile_n)
    partial = jnp.sum(focal)                                   # scalar f32
    # Lane-dense (1, 8, 128) output block: partial in [0,0,0], zeros elsewhere;
    # one unmasked full-vreg store per grid step.
    sub = jax.lax.broadcasted_iota(jnp.int32, (1, 8, 128), dimension=1)
    lane = jax.lax.broadcasted_iota(jnp.int32, (1, 8, 128), dimension=2)
    out_ref[...] = jnp.where((sub == 0) & (lane == 0), partial, 0.0)


def _focal_none_kernel(logits_ref, targets_ref, alphat_ref, out_ref, *,
                       gamma, n_total, tile_n):
    # TODO(synk): if the 'none' path ever becomes hot, restructure this output
    # lane-dense instead of (tile_n, 1) to avoid masked vst stores.
    out_ref[...] = _per_row_focal(logits_ref, targets_ref, alphat_ref,
                                  gamma=gamma, n_total=n_total, tile_n=tile_n)


def _derive_tile_n(n, c, in_bytes, vmem_budget_bytes=32 * 1024 * 1024):
    """Size the batch tile from C / dtype so blocks fit the VMEM budget."""
    row_mult = 16 if in_bytes < 4 else 8
    # Per-row VMEM: double-buffered logits input + ~3 f32 (tile_n, C)
    # temporaries (shifted / exp_shifted / select) + small (tile_n, 1) columns.
    per_row = c * (2 * in_bytes + 3 * 4) + 64
    tile = vmem_budget_bytes // max(per_row, 1)
    tile = max(row_mult, (tile // row_mult) * row_mult)
    tile = min(tile, 1024)            # >=512 keeps ~85% of HBM roofline; cap at 1024
    if n > 512:
        # v7x megacore: guarantee >= 2 grid blocks so the "parallel" axis can
        # shard across both TensorCores (no-op on 1-TC v5e/v6e).
        half = -(-n // 2)
        half = ((half + row_mult - 1) // row_mult) * row_mult
        tile = min(tile, half)
    return tile


def focal_loss(logits, targets, alpha=None, gamma=2.0, reduction="mean",
               tile_n=None):
    """logits: (N, C) float (f32 or bf16), targets: (N,) int, alpha: None | scalar | (C,)."""
    n, c = logits.shape
    in_bytes = jnp.dtype(logits.dtype).itemsize
    # TODO(synk): for very large C (>~8k classes) add a second, last,
    # 'arbitrary' grid axis over C with an online running-max/running-sum
    # logsumexp in (tile_n, 1) scratch so tile_n stays VMEM-bounded in C.

    # Per-sample alpha gather in the wrapper (N*4 bytes, negligible vs N*C logits).
    targets_i32 = targets.astype(jnp.int32)
    if alpha is None:
        alpha_t = jnp.ones((n,), jnp.float32)
    else:
        alpha_arr = jnp.asarray(alpha, jnp.float32).reshape(-1)
        if alpha_arr.shape[0] == 1:
            alpha_t = jnp.broadcast_to(alpha_arr, (n,))
        else:
            alpha_t = alpha_arr[targets_i32]
    alpha_t2d = alpha_t.reshape(n, 1).astype(jnp.float32)
    targets2d = targets_i32.reshape(n, 1)

    row_mult = 16 if in_bytes < 4 else 8
    if tile_n is None:
        tile_n = _derive_tile_n(n, c, in_bytes)
    if tile_n >= n:
        tile_n = n                                  # single full-extent block
    else:
        tile_n = max(row_mult, (tile_n // row_mult) * row_mult)
    num_blocks = -(-n // tile_n)

    grid = (num_blocks,)
    in_specs = [
        pl.BlockSpec((tile_n, c), lambda i: (i, 0)),          # logits tile
        pl.BlockSpec((tile_n, 1), lambda i: (i, 0)),          # targets tile
        pl.BlockSpec((tile_n, 1), lambda i: (i, 0)),          # per-sample alpha tile
    ]
    compiler_params = pltpu.CompilerParams(
        dimension_semantics=("parallel",),                    # shards across TCs on v7x
        vmem_limit_bytes=48 * 1024 * 1024,                    # <=48 MiB: safe on 64 MiB v7x
    )

    if reduction in ("mean", "sum"):
        kernel = functools.partial(_focal_partial_sum_kernel, gamma=float(gamma),
                                   n_total=n, tile_n=tile_n)
        partials = pl.pallas_call(
            kernel,
            out_shape=jax.ShapeDtypeStruct((num_blocks, 8, 128), jnp.float32),
            grid=grid,
            in_specs=in_specs,
            out_specs=pl.BlockSpec((1, 8, 128), lambda i: (i, 0, 0)),
            compiler_params=compiler_params,
        )(logits, targets2d, alpha_t2d)
        total = jnp.sum(partials)                             # tiny wrapper reduce
        if reduction == "mean":
            return total / jnp.float32(n)                     # global N, not per-block
        return total
    elif reduction == "none":
        kernel = functools.partial(_focal_none_kernel, gamma=float(gamma),
                                   n_total=n, tile_n=tile_n)
        per_sample = pl.pallas_call(
            kernel,
            out_shape=jax.ShapeDtypeStruct((num_blocks * tile_n, 1), jnp.float32),
            grid=grid,
            in_specs=in_specs,
            out_specs=pl.BlockSpec((tile_n, 1), lambda i: (i, 0)),
            compiler_params=compiler_params,
        )(logits, targets2d, alpha_t2d)
        return per_sample[:n, 0]
    else:
        raise ValueError(f"unsupported reduction: {reduction!r}")


def _focal_loss_ref(logits, targets, alpha, gamma=2.0, reduction="mean"):
    # pure-JAX reference mirroring the PyTorch module
    logits = logits.astype(jnp.float32)
    lse = jax.nn.logsumexp(logits, axis=-1)
    tl = jnp.take_along_axis(logits, targets[:, None], axis=-1)[:, 0]
    ce = lse - tl
    pt = jnp.exp(-ce)
    focal = (1.0 - pt) ** gamma * ce
    if alpha is not None:
        a = jnp.asarray(alpha, jnp.float32).reshape(-1)
        alpha_t = jnp.broadcast_to(a, targets.shape) if a.shape[0] == 1 else a[targets]
        focal = alpha_t * focal
    if reduction == "mean":
        return jnp.mean(focal)
    if reduction == "sum":
        return jnp.sum(focal)
    return focal


if __name__ == "__main__":
    key = jax.random.PRNGKey(0)
    k1, k2, k3, k4 = jax.random.split(key, 4)

    # Case 1: small single-block batch, default gamma=2, per-class alpha, mean.
    N, C = 8, 32
    logits = jax.random.normal(k1, (N, C), dtype=jnp.float32)
    targets = jax.random.randint(k2, (N,), 0, C, dtype=jnp.int32)
    alpha = jnp.linspace(0.5, 1.5, C, dtype=jnp.float32)

    loss = focal_loss(logits, targets, alpha, gamma=2.0, reduction="mean")
    jax.block_until_ready(loss)
    ref = _focal_loss_ref(logits, targets, alpha, gamma=2.0, reduction="mean")
    assert jnp.allclose(loss, ref, rtol=1e-5, atol=1e-6), (loss, ref)

    # Case 2: multi-block grid with a ragged last tile (N=20, tile=8) -- exercises
    # the parallel grid, the padded-row mask and all three reductions.
    N2 = 20
    logits2 = jax.random.normal(k3, (N2, C), dtype=jnp.float32)
    targets2 = jax.random.randint(k4, (N2,), 0, C, dtype=jnp.int32)
    for red in ("mean", "sum", "none"):
        out = focal_loss(logits2, targets2, alpha, gamma=2.0, reduction=red,
                         tile_n=8)
        jax.block_until_ready(out)
        ref2 = _focal_loss_ref(logits2, targets2, alpha, gamma=2.0, reduction=red)
        assert jnp.allclose(out, ref2, rtol=1e-5, atol=1e-6), (red, out, ref2)

    # Case 3: non-integer gamma (guarded pow path) with a scalar alpha.
    out3 = focal_loss(logits, targets, 0.25, gamma=2.5, reduction="mean")
    jax.block_until_ready(out3)
    ref3 = _focal_loss_ref(logits, targets, 0.25, gamma=2.5, reduction="mean")
    assert jnp.allclose(out3, ref3, rtol=1e-5, atol=1e-6), (out3, ref3)

    # Case 4: bf16 logits, no alpha (x16 sublane rounding path; kernel upcasts).
    logits4 = jax.random.normal(k3, (32, C), dtype=jnp.bfloat16)
    targets4 = jax.random.randint(k4, (32,), 0, C, dtype=jnp.int32)
    out4 = focal_loss(logits4, targets4, None, gamma=2.0, reduction="mean")
    jax.block_until_ready(out4)
    ref4 = _focal_loss_ref(logits4, targets4, None, gamma=2.0, reduction="mean")
    assert jnp.allclose(out4, ref4, rtol=2e-2, atol=2e-3), (out4, ref4)

    print("KERNEL_OK")
</pallas_src>

<mosaic_0001>
module attributes {stable_mosaic.version = 11 : i64} {
  func.func @_focal_partial_sum_kernel(%arg0: i32, %arg1: memref<8x32xf32, #tpu.memory_space<vmem>>, %arg2: memref<8x1xi32, #tpu.memory_space<vmem>>, %arg3: memref<8x1xf32, #tpu.memory_space<vmem>>, %arg4: memref<1x8x128xf32, #tpu.memory_space<vmem>>) attributes {dimension_semantics = [#tpu.dimension_semantics<parallel>], iteration_bounds = array<i64: 1>, scalar_prefetch = 0 : i64, scratch_operands = 0 : i64, tpu.core_type = #tpu.core_type<tc>, window_params = [{transform_indices = @transform_0, window_bounds = array<i64: 8, 32>}, {transform_indices = @transform_1, window_bounds = array<i64: 8, 1>}, {transform_indices = @transform_2, window_bounds = array<i64: 8, 1>}, {transform_indices = @transform_3, window_bounds = array<i64: 1, 8, 128>}]} {
    %c0 = arith.constant 0 : index
    %c0_0 = arith.constant 0 : index
    %0 = vector.load %arg1[%c0, %c0_0] : memref<8x32xf32, #tpu.memory_space<vmem>>, vector<8x32xf32>
    %c0_1 = arith.constant 0 : index
    %c0_2 = arith.constant 0 : index
    %1 = vector.load %arg2[%c0_1, %c0_2] : memref<8x1xi32, #tpu.memory_space<vmem>>, vector<8x1xi32>
    %c0_3 = arith.constant 0 : index
    %c0_4 = arith.constant 0 : index
    %2 = vector.load %arg3[%c0_3, %c0_4] : memref<8x1xf32, #tpu.memory_space<vmem>>, vector<8x1xf32>
    %cst = arith.constant dense<0xFF800000> : vector<8xf32>
    %3 = vector.multi_reduction <maximumf>, %0, %cst [1] : vector<8x32xf32> to vector<8xf32>
    %4 = vector.shape_cast %3 : vector<8xf32> to vector<8x1xf32>
    %5 = vector.broadcast %4 : vector<8x1xf32> to vector<8x32xf32>
    %6 = arith.subf %0, %5 : vector<8x32xf32>
    %7 = math.exp %6 : vector<8x32xf32>
    %cst_5 = arith.constant dense<0.000000e+00> : vector<8xf32>
    %8 = vector.multi_reduction <add>, %7, %cst_5 [1] : vector<8x32xf32> to vector<8xf32>
    %9 = vector.shape_cast %8 : vector<8xf32> to vector<8x1xf32>
    %10 = tpu.iota {dimensions = array<i32: 1>} : vector<8x32xi32>
    %11 = vector.broadcast %1 : vector<8x1xi32> to vector<8x32xi32>
    %12 = arith.cmpi eq, %10, %11 : vector<8x32xi32>
    %cst_6 = arith.constant 0.000000e+00 : f32
    %13 = vector.broadcast %cst_6 : f32 to vector<8x32xf32>
    %14 = arith.select %12, %6, %13 : vector<8x32xi1>, vector<8x32xf32>
    %cst_7 = arith.constant dense<0.000000e+00> : vector<8xf32>
    %15 = vector.multi_reduction <add>, %14, %cst_7 [1] : vector<8x32xf32> to vector<8xf32>
    %16 = vector.shape_cast %15 : vector<8xf32> to vector<8x1xf32>
    %17 = math.log %9 : vector<8x1xf32>
    %18 = arith.subf %17, %16 : vector<8x1xf32>
    %19 = arith.subf %16, %17 : vector<8x1xf32>
    %20 = math.exp %19 : vector<8x1xf32>
    %cst_8 = arith.constant 1.000000e+00 : f32
    %21 = vector.broadcast %cst_8 : f32 to vector<8x1xf32>
    %22 = arith.subf %21, %20 : vector<8x1xf32>
    %cst_9 = arith.constant 0.000000e+00 : f32
    %23 = vector.broadcast %cst_9 : f32 to vector<8x1xf32>
    %24 = arith.maximumf %22, %23 : vector<8x1xf32>
    %25 = arith.mulf %24, %24 : vector<8x1xf32>
    %26 = arith.mulf %2, %25 : vector<8x1xf32>
    %27 = arith.mulf %26, %18 : vector<8x1xf32>
    %28 = tpu.iota {dimensions = array<i32: 0>} : vector<8x1xi32>
    %c8_i32 = arith.constant 8 : i32
    %29 = arith.muli %arg0, %c8_i32 : i32
    %30 = vector.broadcast %29 : i32 to vector<8x1xi32>
    %31 = arith.addi %30, %28 : vector<8x1xi32>
    %c8_i32_10 = arith.constant 8 : i32
    %32 = vector.broadcast %c8_i32_10 : i32 to vector<8x1xi32>
    %33 = arith.cmpi slt, %31, %32 : vector<8x1xi32>
    %cst_11 = arith.constant 0.000000e+00 : f32
    %34 = vector.broadcast %cst_11 : f32 to vector<8x1xf32>
    %35 = arith.select %33, %27, %34 : vector<8x1xi1>, vector<8x1xf32>
    %36 = vector.shape_cast %35 : vector<8x1xf32> to vector<1x8x1xf32>
    %cst_12 = arith.constant dense<0.000000e+00> : vector<1xf32>
    %37 = vector.multi_reduction <add>, %36, %cst_12 [1, 2] : vector<1x8x1xf32> to vector<1xf32>
    %38 = vector.shape_cast %37 : vector<1xf32> to vector<1x1x1xf32>
    %39 = vector.extract %38[0, 0, 0] : f32 from vector<1x1x1xf32>
    %40 = tpu.iota {dimensions = array<i32: 1>} : vector<1x8x128xi32>
    %41 = tpu.iota {dimensions = array<i32: 2>} : vector<1x8x128xi32>
    %c0_i32 = arith.constant 0 : i32
    %42 = vector.broadcast %c0_i32 : i32 to vector<1x8x128xi32>
    %43 = arith.cmpi eq, %40, %42 : vector<1x8x128xi32>
    %c0_i32_13 = arith.constant 0 : i32
    %44 = vector.broadcast %c0_i32_13 : i32 to vector<1x8x128xi32>
    %45 = arith.cmpi eq, %41, %44 : vector<1x8x128xi32>
    %46 = arith.andi %43, %45 : vector<1x8x128xi1>
    %cst_14 = arith.constant 0.000000e+00 : f32
    %47 = vector.broadcast %39 : f32 to vector<1x8x128xf32>
    %48 = vector.broadcast %cst_14 : f32 to vector<1x8x128xf32>
    %49 = arith.select %46, %47, %48 : vector<1x8x128xi1>, vector<1x8x128xf32>
    %c0_15 = arith.constant 0 : index
    %c0_16 = arith.constant 0 : index
    %c0_17 = arith.constant 0 : index
    %50 = vector.load %arg4[%c0_15, %c0_16, %c0_17] : memref<1x8x128xf32, #tpu.memory_space<vmem>>, vector<1x8x128xf32>
    tpu.vector_store %arg4[%c0_15, %c0_16, %c0_17], %49 {strides = array<i32>} : memref<1x8x128xf32, #tpu.memory_space<vmem>>, vector<1x8x128xf32>,
    return
  }
  func.func @transform_0(%arg0: i32) -> (i32, i32) {
    %c0_i32 = arith.constant 0 : i32
    %c0_i32_0 = arith.constant 0 : i32
    return %arg0, %c0_i32 : i32, i32
  }
  func.func @transform_1(%arg0: i32) -> (i32, i32) {
    %c0_i32 = arith.constant 0 : i32
    %c0_i32_0 = arith.constant 0 : i32
    return %arg0, %c0_i32 : i32, i32
  }
  func.func @transform_2(%arg0: i32) -> (i32, i32) {
    %c0_i32 = arith.constant 0 : i32
    %c0_i32_0 = arith.constant 0 : i32
    return %arg0, %c0_i32 : i32, i32
  }
  func.func @transform_3(%arg0: i32) -> (i32, i32, i32) {
    %c0_i32 = arith.constant 0 : i32
    %c0_i32_0 = arith.constant 0 : i32
    %c0_i32_1 = arith.constant 0 : i32
    return %arg0, %c0_i32, %c0_i32_0 : i32, i32, i32
  }
}

</mosaic_0001>

<bundles_post_ra>
// kernel: tpu_custom_call.1
= control target key start
LH: loop header
LB: loop body
LE: loop exit
PB: predicated region body
PF: predicated region fallthrough
CT: control target
= control target key end

     0   :  { %vm18_vm0 = vcmask 261120   ;;  %s168_s0 = inlined_call_operand.vmem [shape: f32[8,32], index: 0, kind: input, shape index: {}]   ;;  %s169_s1 = inlined_call_operand.vmem [shape: s32[8,1], index: 1, kind: input, shape index: {}]   ;;  %s170_s2 = inlined_call_operand.vmem [shape: f32[8,1], index: 2, kind: input, shape index: {}]   ;;  %s171_s3 = inlined_call_operand.hbm [shape: f32[1,8,128], index: 3, kind: output, shape index: {}]  }
   0x1   :  { %v15_v0 = vld [vmem:[%s168_s0] sm:$0xff] }
   0x2   :  { %8 = vsyncpa [#allocation3], 0  ;;  %v19_v1 = vsel %vm18_vm0, %v15_v0, -inf  ;;  %v122_v2 = vmov 0   ;;  %v16_v3 = vld [vmem:[%s169_s1] sm:$0xff]  ;;  %v28_v7 = vlaneseq  ;;  %vm56_vm2 = vcmask 7168  }
   0x3   :  { %91 = vset.pattern.permute.xlu0 %v122_v2  ;;  %v17_v23 = vld [vmem:[%s170_s2] sm:$0xff]  ;;  %s123_s16 = smov [#allocation2]  }
   0x4   :  { %20 = vmax.xlane.f32.xlu0 %v19_v1  ;;  %v29_v8 = vand.u32 127, %v28_v7  ;;  %v50_v36 = vshrl.u32 %v28_v7, 7  ;;  %s79_s2 = sshll.u32 %s123_s16, 4  ;;  %s80_s2 = int_to_ptr.vmem [resolvable:$true] %s79_s2 }
   0x5   :  { %s98_s18 = scalar_lea.vmem %s80_s2, 128  ;;  %p103_p1 = scmp.lt.s32.totalorder %s80_s2, %s80_s2 }
   0x6   :  { %vm67_vm3 = vcmp.eq.s32.totalorder %v50_v36, 0  ;;  %vm68_vm4 = vcmp.eq.s32.totalorder %v29_v8, 0  ;;  %p99_p0 = scmp.ne.s32.totalorder %s80_s2, %s98_s18  ;;  %p104_p2 = scmp.lt.s32.totalorder %s98_s18, %s98_s18 }
   0x7   :  { %vm69_vm5 = vmand %vm67_vm3, %vm68_vm4 }
   0x8   :  { %p105_p3 = por %p104_p2, %p103_p1 }
   0xa   :  { %p106_p4 = pnand %p105_p3, %p99_p0 }
  0x1a   :  { %31 = vperm.xlu0 %91, %v16_v3  }
  0x91   :  { %v21_v4 = vpop.xlane.xlu0 %20 }
  0x92   :  { %v22_v5 = vsub.f32 %v15_v0, %v21_v4 }
  0x94   :  { %v23_v6 = vmul.f32 1.442695, %v22_v5 }
  0x96   :  { %92 = vpow2.f32 %v23_v6 }
  0x99   :  { %v32_v9 = vpop.permute.xlu0 %31 }
  0x9a   :  { %vm33_vm1 = vcmp.eq.s32.totalorder %v29_v8, %v32_v9 }
  0x9b   :  { %v34_v12 = vsel %vm33_vm1, %v22_v5, 0.0 }
  0x9c   :  { %v35_v13 = vsel %vm18_vm0, %v34_v12, 0.0 }
  0xa0   :  { %v93_v10 = vpop.eup %92 }
  0xa1   :  { %v25_v11 = vsel %vm18_vm0, %v93_v10, 0.0 }
  0xa2   :  { %26 = vadd.xlane.f32.xlu1 %v25_v11 }
  0xa6   :  { %36 = vadd.xlane.f32.xlu1 %v35_v13 }
 0x12f   :  { %v27_v14 = vpop.xlane.xlu1 %26 }
 0x130   :  { %94 = vlog2.f32 %v27_v14 }
 0x133   :  { %v37_v17 = vpop.xlane.xlu1 %36 }
 0x13a   :  { %v95_v15 = vpop.eup %94 }
 0x13b   :  { %v39_v16 = vmul.f32 0.6931472, %v95_v15 }
 0x13d   :  { %v41_v18 = vsub.f32 %v37_v17, %v39_v16  ;;  %v40_v25 = vsub.f32 %v39_v16, %v37_v17 }
 0x13f   :  { %v42_v19 = vmul.f32 1.442695, %v41_v18 }
 0x141   :  { %96 = vpow2.f32 %v42_v19 }
 0x14b   :  { %v97_v20 = vpop.eup %96 }
 0x14c   :  { %v44_v21 = vsub.f32 1.0, %v97_v20 }
 0x14e   :  { %v45_v22 = vmax.f32 %v44_v21, 0.0 }
 0x150   :  { %v46_v24 = vmul.f32 %v45_v22, %v45_v22 }
 0x152   :  { %v47_v26 = vmul.f32 %v46_v24, %v17_v23 }
 0x154   :  { %v48_v27 = vmul.f32 %v47_v26, %v40_v25 }
 0x156   :  { %v57_v28 = vsel %vm56_vm2, %v48_v27, 0.0 }
 0x157   :  { %58 = vadd.xlane.f32.xlu1 %v57_v28 }
 0x1e4   :  { %v59_v29 = vpop.xlane.xlu1 %58 }
 0x1e5   :  { %v60_v30 = vrot.slane %v59_v29, 4 }
 0x1e7   :  { %v61_v31 = vadd.f32 %v60_v30, %v59_v29 }
 0x1e9   :  { %v62_v32 = vrot.slane %v61_v31, 2 }
 0x1eb   :  { %v63_v33 = vadd.f32 %v62_v32, %v61_v31 }
 0x1ed   :  { %v64_v34 = vrot.slane %v63_v33, 1 }
 0x1ef   :  { %v65_v35 = vadd.f32 %v64_v34, %v63_v33 }
 0x1f1   :  { %87 = vpush %v65_v35 }
 0x222   :  { %s88_s17 = spop %87 }
 0x223   :  { %v70_v37 = vstv %s88_s17 }
 0x224   :  { %v71_v38 = vsel %vm69_vm5, %v70_v37, 0.0 }
 0x225   :  { %72 = vst [vmem:[#allocation2] sm:$0xff] %v71_v38 }
 0x226   :  { %109 = shalt.err (!%p106_p4)
}
 0x227   :  { %s110_s21 = scalar_lea.hbm %s171_s3, 128 }
 0x228   :  { %p111_p5 = scmp.ne.s32.totalorder %s171_s3, %s110_s21  ;;  %p114_p6 = scmp.lt.u32.totalorder %s110_s21, %s171_s3 }
 0x22a   :  { %p116_p7 = pnand %p114_p6, %p111_p5 }
 0x22c   :  { %119 = shalt.err (!%p116_p7)
}
 0x22d   :  { %82 = dma.vmem_to_hbm [thread:$0]  %s80_s2, 128, %s171_s3, [#allocation3]  }
 0x22e   :  { %120 = dma.done.wait [#allocation3], 128  }
 0x22f   :  { %121 = vsyncadd [#allocation3], 4294967168 }
 0x230   :  { %86 = vsyncpa [#allocation3], 1 }

</bundles_post_ra>
